<compile_context>
chip_gen: v7x
topology: tpu7x:2x2x1
jax: 0.10.0
libtpu: 0.0.40
codegen_flags: <defaults>
</compile_context>

<pallas_src>
import functools

import jax
import jax.numpy as jnp
from jax.experimental import pallas as pl
from jax.experimental.pallas import tpu as pltpu

LANE = 128      # lane width: last-dim padding target
SUBLANE = 8     # sublane width: second-to-last-dim padding target


# ----------------------------- helpers ------------------------------------

def _round_up(x, m):
    return ((x + m - 1) // m) * m


def _pick_tile(dim, pref):
    """Largest tile in {pref, 512, 256, 128} dividing `dim`, else `dim` itself."""
    for t in (pref, 512, 256, 128):
        if t <= dim and dim % t == 0:
            return t
    return dim


# ----------------------------- Pallas kernel -------------------------------

def _matmul_bias_kernel(x_ref, w_ref, b_ref, o_ref, acc_ref, *, apply_relu):
    k = pl.program_id(2)

    @pl.when(k == 0)
    def _():
        acc_ref[...] = jnp.zeros_like(acc_ref)

    acc_ref[...] += jnp.dot(x_ref[...], w_ref[...],
                            preferred_element_type=jnp.float32)

    @pl.when(k == pl.num_programs(2) - 1)
    def _():
        out = acc_ref[...] + b_ref[...].astype(jnp.float32)
        if apply_relu:
            out = jnp.maximum(out, 0.0)
        o_ref[...] = out.astype(o_ref.dtype)


def pallas_matmul(x, w, b=None, *, relu=False, out_dtype=jnp.float32):
    """out = [relu](x @ w + b) with a tiled, pipelined Pallas matmul.

    Shapes must already be padded so that the last dim of every operand is a
    multiple of 128 (or equals the full dim) and M is a multiple of 8.
    """
    m, k = x.shape
    k2, n = w.shape
    assert k == k2, (x.shape, w.shape)
    if b is None:
        b = jnp.zeros((n,), jnp.float32)
    b2 = jnp.asarray(b, jnp.float32).reshape(1, n)

    tm = _pick_tile(m, 256)
    tn = _pick_tile(n, 256)
    tk = _pick_tile(k, 512)
    grid = (m // tm, n // tn, k // tk)

    kernel = functools.partial(_matmul_bias_kernel, apply_relu=relu)
    return pl.pallas_call(
        kernel,
        out_shape=jax.ShapeDtypeStruct((m, n), out_dtype),
        grid_spec=pltpu.PrefetchScalarGridSpec(
            num_scalar_prefetch=0,
            grid=grid,
            in_specs=[
                pl.BlockSpec((tm, tk), lambda i, j, kk: (i, kk)),
                pl.BlockSpec((tk, tn), lambda i, j, kk: (kk, j)),
                pl.BlockSpec((1, tn), lambda i, j, kk: (0, j)),
            ],
            out_specs=pl.BlockSpec((tm, tn), lambda i, j, kk: (i, j)),
            scratch_shapes=[pltpu.VMEM((tm, tn), jnp.float32)],
        ),
        compiler_params=pltpu.CompilerParams(
            dimension_semantics=("parallel", "parallel", "arbitrary"),
            vmem_limit_bytes=32 * 1024 * 1024,
        ),
    )(x, w, b2)


# --------------------------- plain-JAX glue ---------------------------------

def build_normalized_adjacency(edge_index, num_nodes, n_pad):
    """A_hat = D^{-1/2}(A + I)D^{-1/2}, zero-padded to (n_pad, n_pad).

    Duplicate edges scatter-add (matches PyG GCNConv); padded rows/cols are 0.
    """
    src, dst = edge_index[0], edge_index[1]
    a = jnp.zeros((n_pad, n_pad), jnp.float32).at[dst, src].add(1.0)
    self_loops = (jnp.arange(n_pad) < num_nodes).astype(jnp.float32)
    a = a + jnp.diag(self_loops)
    deg = a.sum(axis=1)
    dinv = jnp.where(deg > 0, 1.0 / jnp.sqrt(deg), 0.0)
    return dinv[:, None] * a * dinv[None, :]


def build_pool_matrix(batch, num_graphs, num_nodes, g_pad, n_pad):
    """P[g, n] = 1/|graph g| if batch[n] == g else 0; padded nodes/graphs -> 0."""
    b = jnp.full((n_pad,), -1, jnp.int32).at[:num_nodes].set(batch)
    one_hot = (b[None, :] == jnp.arange(g_pad)[:, None]).astype(jnp.float32)
    counts = jnp.maximum(one_hot.sum(axis=1, keepdims=True), 1.0)
    return one_hot / counts


def init_params(key, input_dim, hidden_dim, output_dim, num_layers):
    """Deterministic glorot-uniform weights stored as (in, out)."""
    dims = [input_dim] + [hidden_dim] * (num_layers - 1) + [output_dim]
    params = []
    for i in range(num_layers):
        key, kw = jax.random.split(key)
        fan_in, fan_out = dims[i], dims[i + 1]
        limit = jnp.sqrt(6.0 / (fan_in + fan_out))
        w = jax.random.uniform(kw, (fan_in, fan_out), jnp.float32, -limit, limit)
        b = jnp.zeros((fan_out,), jnp.float32)
        params.append((w, b))
    return params


def _pad_weight(w):
    fi, fo = w.shape
    return jnp.pad(w, ((0, _round_up(fi, LANE) - fi),
                       (0, _round_up(fo, LANE) - fo))).astype(jnp.bfloat16)


def _pad_bias(b):
    fo = b.shape[0]
    return jnp.pad(b, (0, _round_up(fo, LANE) - fo))


@functools.partial(jax.jit, static_argnames="num_graphs")
def gcn_forward(x, edge_index, batch, params, *, num_graphs):
    num_nodes, in_dim = x.shape
    out_dim = params[-1][0].shape[1]

    n_pad = _round_up(num_nodes, LANE)
    g_pad = _round_up(num_graphs, SUBLANE)

    # A_hat built & cast to bf16 once, reused for every conv layer.
    a_hat = build_normalized_adjacency(edge_index, num_nodes, n_pad)
    a_hat = a_hat.astype(jnp.bfloat16)

    h = jnp.pad(x, ((0, n_pad - num_nodes),
                    (0, _round_up(in_dim, LANE) - in_dim))).astype(jnp.bfloat16)

    # GCNConv + ReLU layers (all but last parameter set).
    for (w, bias) in params[:-1]:
        xw = pallas_matmul(h, _pad_weight(w), relu=False,
                           out_dtype=jnp.bfloat16)                   # X @ W
        h = pallas_matmul(a_hat, xw, _pad_bias(bias), relu=True,
                          out_dtype=jnp.bfloat16)                    # relu(A_hat @ XW + b)

    # global_mean_pool as a tiled matmul with the normalized indicator matrix.
    pool = build_pool_matrix(batch, num_graphs, num_nodes, g_pad, n_pad)
    pooled = pallas_matmul(pool.astype(jnp.bfloat16), h, relu=False,
                           out_dtype=jnp.bfloat16)

    # TODO(synk): dropout is identity (eval mode); training-mode dropout would
    # use pltpu.prng_seed / pltpu.prng_random_bits inside the kernel.

    w_lin, b_lin = params[-1]
    out = pallas_matmul(pooled, _pad_weight(w_lin), _pad_bias(b_lin),
                        relu=False, out_dtype=jnp.float32)
    return out[:num_graphs, :out_dim]


# ------------------------- plain-JAX reference -------------------------------

def reference_forward(x, edge_index, batch, params, num_graphs):
    n = x.shape[0]
    src, dst = edge_index[0], edge_index[1]
    a = jnp.zeros((n, n), jnp.float32).at[dst, src].add(1.0) + jnp.eye(n)
    deg = a.sum(axis=1)
    dinv = jnp.where(deg > 0, 1.0 / jnp.sqrt(deg), 0.0)
    a_hat = dinv[:, None] * a * dinv[None, :]
    h = x
    for (w, b) in params[:-1]:
        h = jnp.maximum(a_hat @ (h @ w) + b, 0.0)
    one_hot = (batch[None, :] == jnp.arange(num_graphs)[:, None]).astype(jnp.float32)
    pooled = (one_hot @ h) / jnp.maximum(one_hot.sum(axis=1, keepdims=True), 1.0)
    w_lin, b_lin = params[-1]
    return pooled @ w_lin + b_lin


# ------------------------------- demo ----------------------------------------

if __name__ == "__main__":
    key = jax.random.PRNGKey(0)

    # Small synthetic graph batch: 2 graphs of 8 nodes each (16 nodes total).
    num_nodes = 16
    num_graphs = 2
    input_dim, hidden_dim, output_dim, num_layers = 8, 32, 4, 3

    key, kx = jax.random.split(key)
    x = jax.random.normal(kx, (num_nodes, input_dim), jnp.float32)

    # Undirected ring within each graph (edges listed in both directions).
    srcs, dsts = [], []
    for g in range(num_graphs):
        base = g * 8
        for i in range(8):
            u, v = base + i, base + (i + 1) % 8
            srcs += [u, v]
            dsts += [v, u]
    edge_index = jnp.array([srcs, dsts], dtype=jnp.int32)   # (2, E)
    batch = jnp.array([0] * 8 + [1] * 8, dtype=jnp.int32)   # node -> graph id

    params = init_params(key, input_dim, hidden_dim, output_dim, num_layers)

    out = gcn_forward(x, edge_index, batch, params, num_graphs=num_graphs)
    out = jax.block_until_ready(out)
    assert out.shape == (num_graphs, output_dim), out.shape

    ref = reference_forward(x, edge_index, batch, params, num_graphs)
    err = float(jnp.max(jnp.abs(out - ref)))
    assert err < 0.1, f"max abs err vs reference too large: {err}"

    print("KERNEL_OK")
</pallas_src>

<mosaic_0001>
module attributes {stable_mosaic.version = 11 : i64} {
  func.func private @main(%arg0: i32) attributes {dimension_semantics = [#tpu.dimension_semantics<core_parallel>], iteration_bounds = array<i64: 2>, tpu.core_type = #tpu.core_type<sc_scalar_subcore>, window_params = []} {
    return
  }
}

module attributes {stable_mosaic.version = 11 : i64} {
  func.func private @main(%arg0: i32) attributes {dimension_semantics = [#tpu.dimension_semantics<core_parallel>], iteration_bounds = array<i64: 2>, tpu.core_type = #tpu.core_type<sc_scalar_subcore>, window_params = []} {
    return
  }
}

module attributes {stable_mosaic.version = 11 : i64} {
  func.func @_matmul_bias_kernel(%arg0: i32, %arg1: i32, %arg2: i32, %arg3: memref<128x128xbf16, #tpu.memory_space<vmem>>, %arg4: memref<128x128xbf16, #tpu.memory_space<vmem>>, %arg5: memref<1x128xf32, #tpu.memory_space<vmem>>, %arg6: memref<128x128xbf16, #tpu.memory_space<vmem>>, %arg7: memref<128x128xf32, #tpu.memory_space<vmem>>) attributes {dimension_semantics = [#tpu.dimension_semantics<parallel>, #tpu.dimension_semantics<parallel>, #tpu.dimension_semantics<arbitrary>], iteration_bounds = array<i64: 1, 1, 1>, scalar_prefetch = 0 : i64, scratch_operands = 1 : i64, tpu.core_type = #tpu.core_type<tc>, window_params = [{transform_indices = @transform_0, window_bounds = array<i64: 128, 128>}, {transform_indices = @transform_1, window_bounds = array<i64: 128, 128>}, {transform_indices = @transform_2, window_bounds = array<i64: 1, 128>}, {transform_indices = @transform_3, window_bounds = array<i64: 128, 128>}]} {
    %c0_i32 = arith.constant 0 : i32
    %0 = arith.cmpi eq, %arg2, %c0_i32 : i32
    %1 = arith.extui %0 : i1 to i32
    %c0_i32_0 = arith.constant 0 : i32
    %2 = arith.cmpi ne, %1, %c0_i32_0 : i32
    scf.if %2 {
      %cst_10 = arith.constant 0.000000e+00 : f32
      %12 = vector.broadcast %cst_10 : f32 to vector<128x128xf32>
      %c0_11 = arith.constant 0 : index
      %c0_12 = arith.constant 0 : index
      %13 = vector.load %arg7[%c0_11, %c0_12] : memref<128x128xf32, #tpu.memory_space<vmem>>, vector<128x128xf32>
      tpu.vector_store %arg7[%c0_11, %c0_12], %12 {strides = array<i32>} : memref<128x128xf32, #tpu.memory_space<vmem>>, vector<128x128xf32>,
    } else {
    }
    %c0 = arith.constant 0 : index
    %c0_1 = arith.constant 0 : index
    %3 = vector.load %arg7[%c0, %c0_1] : memref<128x128xf32, #tpu.memory_space<vmem>>, vector<128x128xf32>
    %c0_2 = arith.constant 0 : index
    %c0_3 = arith.constant 0 : index
    %4 = vector.load %arg3[%c0_2, %c0_3] : memref<128x128xbf16, #tpu.memory_space<vmem>>, vector<128x128xbf16>
    %c0_4 = arith.constant 0 : index
    %c0_5 = arith.constant 0 : index
    %5 = vector.load %arg4[%c0_4, %c0_5] : memref<128x128xbf16, #tpu.memory_space<vmem>>, vector<128x128xbf16>
    %cst = arith.constant dense<0.000000e+00> : vector<128x128xf32>
    %6 = tpu.matmul %4, %5, %cst {dimension_numbers = #tpu.dot_dimension_numbers<[1], [0], [0], [1], [0, 0, 1, 1], [], []>} : vector<128x128xbf16>, vector<128x128xbf16>, vector<128x128xf32> -> vector<128x128xf32>
    %7 = arith.addf %3, %6 : vector<128x128xf32>
    %c0_6 = arith.constant 0 : index
    %c0_7 = arith.constant 0 : index
    %8 = vector.load %arg7[%c0_6, %c0_7] : memref<128x128xf32, #tpu.memory_space<vmem>>, vector<128x128xf32>
    tpu.vector_store %arg7[%c0_6, %c0_7], %7 {strides = array<i32>} : memref<128x128xf32, #tpu.memory_space<vmem>>, vector<128x128xf32>,
    %c0_i32_8 = arith.constant 0 : i32
    %9 = arith.cmpi eq, %arg2, %c0_i32_8 : i32
    %10 = arith.extui %9 : i1 to i32
    %c0_i32_9 = arith.constant 0 : i32
    %11 = arith.cmpi ne, %10, %c0_i32_9 : i32
    scf.if %11 {
      %c0_10 = arith.constant 0 : index
      %c0_11 = arith.constant 0 : index
      %12 = vector.load %arg7[%c0_10, %c0_11] : memref<128x128xf32, #tpu.memory_space<vmem>>, vector<128x128xf32>
      %c0_12 = arith.constant 0 : index
      %c0_13 = arith.constant 0 : index
      %13 = vector.load %arg5[%c0_12, %c0_13] : memref<1x128xf32, #tpu.memory_space<vmem>>, vector<1x128xf32>
      %14 = vector.broadcast %13 : vector<1x128xf32> to vector<128x128xf32>
      %15 = arith.addf %12, %14 : vector<128x128xf32>
      %cst_14 = arith.constant 0.000000e+00 : f32
      %16 = vector.broadcast %cst_14 : f32 to vector<128x128xf32>
      %17 = arith.maximumf %15, %16 : vector<128x128xf32>
      %18 = arith.truncf %17 : vector<128x128xf32> to vector<128x128xbf16>
      %c0_15 = arith.constant 0 : index
      %c0_16 = arith.constant 0 : index
      %19 = vector.load %arg6[%c0_15, %c0_16] : memref<128x128xbf16, #tpu.memory_space<vmem>>, vector<128x128xbf16>
      tpu.vector_store %arg6[%c0_15, %c0_16], %18 {strides = array<i32>} : memref<128x128xbf16, #tpu.memory_space<vmem>>, vector<128x128xbf16>,
    } else {
    }
    return
  }
  func.func @transform_0(%arg0: i32, %arg1: i32, %arg2: i32) -> (i32, i32) {
    %c0_i32 = arith.constant 0 : i32
    return %arg0, %arg2 : i32, i32
  }
  func.func @transform_1(%arg0: i32, %arg1: i32, %arg2: i32) -> (i32, i32) {
    %c0_i32 = arith.constant 0 : i32
    return %arg2, %arg1 : i32, i32
  }
  func.func @transform_2(%arg0: i32, %arg1: i32, %arg2: i32) -> (i32, i32) {
    %c0_i32 = arith.constant 0 : i32
    %c0_i32_0 = arith.constant 0 : i32
    return %c0_i32, %arg1 : i32, i32
  }
  func.func @transform_3(%arg0: i32, %arg1: i32, %arg2: i32) -> (i32, i32) {
    %c0_i32 = arith.constant 0 : i32
    return %arg0, %arg1 : i32, i32
  }
}

module attributes {stable_mosaic.version = 11 : i64} {
  func.func @_matmul_bias_kernel(%arg0: i32, %arg1: i32, %arg2: i32, %arg3: memref<8x128xbf16, #tpu.memory_space<vmem>>, %arg4: memref<128x128xbf16, #tpu.memory_space<vmem>>, %arg5: memref<1x128xf32, #tpu.memory_space<vmem>>, %arg6: memref<8x128xf32, #tpu.memory_space<vmem>>, %arg7: memref<8x128xf32, #tpu.memory_space<vmem>>) attributes {dimension_semantics = [#tpu.dimension_semantics<parallel>, #tpu.dimension_semantics<parallel>, #tpu.dimension_semantics<arbitrary>], iteration_bounds = array<i64: 1, 1, 1>, scalar_prefetch = 0 : i64, scratch_operands = 1 : i64, tpu.core_type = #tpu.core_type<tc>, window_params = [{transform_indices = @transform_0, window_bounds = array<i64: 8, 128>}, {transform_indices = @transform_1, window_bounds = array<i64: 128, 128>}, {transform_indices = @transform_2, window_bounds = array<i64: 1, 128>}, {transform_indices = @transform_3, window_bounds = array<i64: 8, 128>}]} {
    %c0_i32 = arith.constant 0 : i32
    %0 = arith.cmpi eq, %arg2, %c0_i32 : i32
    %1 = arith.extui %0 : i1 to i32
    %c0_i32_0 = arith.constant 0 : i32
    %2 = arith.cmpi ne, %1, %c0_i32_0 : i32
    scf.if %2 {
      %cst_10 = arith.constant 0.000000e+00 : f32
      %12 = vector.broadcast %cst_10 : f32 to vector<8x128xf32>
      %c0_11 = arith.constant 0 : index
      %c0_12 = arith.constant 0 : index
      %13 = vector.load %arg7[%c0_11, %c0_12] : memref<8x128xf32, #tpu.memory_space<vmem>>, vector<8x128xf32>
      tpu.vector_store %arg7[%c0_11, %c0_12], %12 {strides = array<i32>} : memref<8x128xf32, #tpu.memory_space<vmem>>, vector<8x128xf32>,
    } else {
    }
    %c0 = arith.constant 0 : index
    %c0_1 = arith.constant 0 : index
    %3 = vector.load %arg7[%c0, %c0_1] : memref<8x128xf32, #tpu.memory_space<vmem>>, vector<8x128xf32>
    %c0_2 = arith.constant 0 : index
    %c0_3 = arith.constant 0 : index
    %4 = vector.load %arg3[%c0_2, %c0_3] : memref<8x128xbf16, #tpu.memory_space<vmem>>, vector<8x128xbf16>
    %c0_4 = arith.constant 0 : index
    %c0_5 = arith.constant 0 : index
    %5 = vector.load %arg4[%c0_4, %c0_5] : memref<128x128xbf16, #tpu.memory_space<vmem>>, vector<128x128xbf16>
    %cst = arith.constant dense<0.000000e+00> : vector<8x128xf32>
    %6 = tpu.matmul %4, %5, %cst {dimension_numbers = #tpu.dot_dimension_numbers<[1], [0], [0], [1], [0, 0, 1, 1], [], []>} : vector<8x128xbf16>, vector<128x128xbf16>, vector<8x128xf32> -> vector<8x128xf32>
    %7 = arith.addf %3, %6 : vector<8x128xf32>
    %c0_6 = arith.constant 0 : index
    %c0_7 = arith.constant 0 : index
    %8 = vector.load %arg7[%c0_6, %c0_7] : memref<8x128xf32, #tpu.memory_space<vmem>>, vector<8x128xf32>
    tpu.vector_store %arg7[%c0_6, %c0_7], %7 {strides = array<i32>} : memref<8x128xf32, #tpu.memory_space<vmem>>, vector<8x128xf32>,
    %c0_i32_8 = arith.constant 0 : i32
    %9 = arith.cmpi eq, %arg2, %c0_i32_8 : i32
    %10 = arith.extui %9 : i1 to i32
    %c0_i32_9 = arith.constant 0 : i32
    %11 = arith.cmpi ne, %10, %c0_i32_9 : i32
    scf.if %11 {
      %c0_10 = arith.constant 0 : index
      %c0_11 = arith.constant 0 : index
      %12 = vector.load %arg7[%c0_10, %c0_11] : memref<8x128xf32, #tpu.memory_space<vmem>>, vector<8x128xf32>
      %c0_12 = arith.constant 0 : index
      %c0_13 = arith.constant 0 : index
      %13 = vector.load %arg5[%c0_12, %c0_13] : memref<1x128xf32, #tpu.memory_space<vmem>>, vector<1x128xf32>
      %14 = vector.broadcast %13 : vector<1x128xf32> to vector<8x128xf32>
      %15 = arith.addf %12, %14 : vector<8x128xf32>
      %c0_14 = arith.constant 0 : index
      %c0_15 = arith.constant 0 : index
      %16 = vector.load %arg6[%c0_14, %c0_15] : memref<8x128xf32, #tpu.memory_space<vmem>>, vector<8x128xf32>
      tpu.vector_store %arg6[%c0_14, %c0_15], %15 {strides = array<i32>} : memref<8x128xf32, #tpu.memory_space<vmem>>, vector<8x128xf32>,
    } else {
    }
    return
  }
  func.func @transform_0(%arg0: i32, %arg1: i32, %arg2: i32) -> (i32, i32) {
    %c0_i32 = arith.constant 0 : i32
    return %arg0, %arg2 : i32, i32
  }
  func.func @transform_1(%arg0: i32, %arg1: i32, %arg2: i32) -> (i32, i32) {
    %c0_i32 = arith.constant 0 : i32
    return %arg2, %arg1 : i32, i32
  }
  func.func @transform_2(%arg0: i32, %arg1: i32, %arg2: i32) -> (i32, i32) {
    %c0_i32 = arith.constant 0 : i32
    %c0_i32_0 = arith.constant 0 : i32
    return %c0_i32, %arg1 : i32, i32
  }
  func.func @transform_3(%arg0: i32, %arg1: i32, %arg2: i32) -> (i32, i32) {
    %c0_i32 = arith.constant 0 : i32
    return %arg0, %arg1 : i32, i32
  }
}

module attributes {stable_mosaic.version = 11 : i64} {
  func.func @_matmul_bias_kernel(%arg0: i32, %arg1: i32, %arg2: i32, %arg3: memref<128x128xbf16, #tpu.memory_space<vmem>>, %arg4: memref<128x128xbf16, #tpu.memory_space<vmem>>, %arg5: memref<1x128xf32, #tpu.memory_space<vmem>>, %arg6: memref<128x128xbf16, #tpu.memory_space<vmem>>, %arg7: memref<128x128xf32, #tpu.memory_space<vmem>>) attributes {dimension_semantics = [#tpu.dimension_semantics<parallel>, #tpu.dimension_semantics<parallel>, #tpu.dimension_semantics<arbitrary>], iteration_bounds = array<i64: 1, 1, 1>, scalar_prefetch = 0 : i64, scratch_operands = 1 : i64, tpu.core_type = #tpu.core_type<tc>, window_params = [{transform_indices = @transform_0, window_bounds = array<i64: 128, 128>}, {transform_indices = @transform_1, window_bounds = array<i64: 128, 128>}, {transform_indices = @transform_2, window_bounds = array<i64: 1, 128>}, {transform_indices = @transform_3, window_bounds = array<i64: 128, 128>}]} {
    %c0_i32 = arith.constant 0 : i32
    %0 = arith.cmpi eq, %arg2, %c0_i32 : i32
    %1 = arith.extui %0 : i1 to i32
    %c0_i32_0 = arith.constant 0 : i32
    %2 = arith.cmpi ne, %1, %c0_i32_0 : i32
    scf.if %2 {
      %cst_10 = arith.constant 0.000000e+00 : f32
      %12 = vector.broadcast %cst_10 : f32 to vector<128x128xf32>
      %c0_11 = arith.constant 0 : index
      %c0_12 = arith.constant 0 : index
      %13 = vector.load %arg7[%c0_11, %c0_12] : memref<128x128xf32, #tpu.memory_space<vmem>>, vector<128x128xf32>
      tpu.vector_store %arg7[%c0_11, %c0_12], %12 {strides = array<i32>} : memref<128x128xf32, #tpu.memory_space<vmem>>, vector<128x128xf32>,
    } else {
    }
    %c0 = arith.constant 0 : index
    %c0_1 = arith.constant 0 : index
    %3 = vector.load %arg7[%c0, %c0_1] : memref<128x128xf32, #tpu.memory_space<vmem>>, vector<128x128xf32>
    %c0_2 = arith.constant 0 : index
    %c0_3 = arith.constant 0 : index
    %4 = vector.load %arg3[%c0_2, %c0_3] : memref<128x128xbf16, #tpu.memory_space<vmem>>, vector<128x128xbf16>
    %c0_4 = arith.constant 0 : index
    %c0_5 = arith.constant 0 : index
    %5 = vector.load %arg4[%c0_4, %c0_5] : memref<128x128xbf16, #tpu.memory_space<vmem>>, vector<128x128xbf16>
    %cst = arith.constant dense<0.000000e+00> : vector<128x128xf32>
    %6 = tpu.matmul %4, %5, %cst {dimension_numbers = #tpu.dot_dimension_numbers<[1], [0], [0], [1], [0, 0, 1, 1], [], []>} : vector<128x128xbf16>, vector<128x128xbf16>, vector<128x128xf32> -> vector<128x128xf32>
    %7 = arith.addf %3, %6 : vector<128x128xf32>
    %c0_6 = arith.constant 0 : index
    %c0_7 = arith.constant 0 : index
    %8 = vector.load %arg7[%c0_6, %c0_7] : memref<128x128xf32, #tpu.memory_space<vmem>>, vector<128x128xf32>
    tpu.vector_store %arg7[%c0_6, %c0_7], %7 {strides = array<i32>} : memref<128x128xf32, #tpu.memory_space<vmem>>, vector<128x128xf32>,
    %c0_i32_8 = arith.constant 0 : i32
    %9 = arith.cmpi eq, %arg2, %c0_i32_8 : i32
    %10 = arith.extui %9 : i1 to i32
    %c0_i32_9 = arith.constant 0 : i32
    %11 = arith.cmpi ne, %10, %c0_i32_9 : i32
    scf.if %11 {
      %c0_10 = arith.constant 0 : index
      %c0_11 = arith.constant 0 : index
      %12 = vector.load %arg7[%c0_10, %c0_11] : memref<128x128xf32, #tpu.memory_space<vmem>>, vector<128x128xf32>
      %c0_12 = arith.constant 0 : index
      %c0_13 = arith.constant 0 : index
      %13 = vector.load %arg5[%c0_12, %c0_13] : memref<1x128xf32, #tpu.memory_space<vmem>>, vector<1x128xf32>
      %14 = vector.broadcast %13 : vector<1x128xf32> to vector<128x128xf32>
      %15 = arith.addf %12, %14 : vector<128x128xf32>
      %16 = arith.truncf %15 : vector<128x128xf32> to vector<128x128xbf16>
      %c0_14 = arith.constant 0 : index
      %c0_15 = arith.constant 0 : index
      %17 = vector.load %arg6[%c0_14, %c0_15] : memref<128x128xbf16, #tpu.memory_space<vmem>>, vector<128x128xbf16>
      tpu.vector_store %arg6[%c0_14, %c0_15], %16 {strides = array<i32>} : memref<128x128xbf16, #tpu.memory_space<vmem>>, vector<128x128xbf16>,
    } else {
    }
    return
  }
  func.func @transform_0(%arg0: i32, %arg1: i32, %arg2: i32) -> (i32, i32) {
    %c0_i32 = arith.constant 0 : i32
    return %arg0, %arg2 : i32, i32
  }
  func.func @transform_1(%arg0: i32, %arg1: i32, %arg2: i32) -> (i32, i32) {
    %c0_i32 = arith.constant 0 : i32
    return %arg2, %arg1 : i32, i32
  }
  func.func @transform_2(%arg0: i32, %arg1: i32, %arg2: i32) -> (i32, i32) {
    %c0_i32 = arith.constant 0 : i32
    %c0_i32_0 = arith.constant 0 : i32
    return %c0_i32, %arg1 : i32, i32
  }
  func.func @transform_3(%arg0: i32, %arg1: i32, %arg2: i32) -> (i32, i32) {
    %c0_i32 = arith.constant 0 : i32
    return %arg0, %arg1 : i32, i32
  }
}

module attributes {stable_mosaic.version = 11 : i64} {
  func.func @_matmul_bias_kernel(%arg0: i32, %arg1: i32, %arg2: i32, %arg3: memref<8x128xbf16, #tpu.memory_space<vmem>>, %arg4: memref<128x128xbf16, #tpu.memory_space<vmem>>, %arg5: memref<1x128xf32, #tpu.memory_space<vmem>>, %arg6: memref<8x128xbf16, #tpu.memory_space<vmem>>, %arg7: memref<8x128xf32, #tpu.memory_space<vmem>>) attributes {dimension_semantics = [#tpu.dimension_semantics<parallel>, #tpu.dimension_semantics<parallel>, #tpu.dimension_semantics<arbitrary>], iteration_bounds = array<i64: 1, 1, 1>, scalar_prefetch = 0 : i64, scratch_operands = 1 : i64, tpu.core_type = #tpu.core_type<tc>, window_params = [{transform_indices = @transform_0, window_bounds = array<i64: 8, 128>}, {transform_indices = @transform_1, window_bounds = array<i64: 128, 128>}, {transform_indices = @transform_2, window_bounds = array<i64: 1, 128>}, {transform_indices = @transform_3, window_bounds = array<i64: 8, 128>}]} {
    %c0_i32 = arith.constant 0 : i32
    %0 = arith.cmpi eq, %arg2, %c0_i32 : i32
    %1 = arith.extui %0 : i1 to i32
    %c0_i32_0 = arith.constant 0 : i32
    %2 = arith.cmpi ne, %1, %c0_i32_0 : i32
    scf.if %2 {
      %cst_10 = arith.constant 0.000000e+00 : f32
      %12 = vector.broadcast %cst_10 : f32 to vector<8x128xf32>
      %c0_11 = arith.constant 0 : index
      %c0_12 = arith.constant 0 : index
      %13 = vector.load %arg7[%c0_11, %c0_12] : memref<8x128xf32, #tpu.memory_space<vmem>>, vector<8x128xf32>
      tpu.vector_store %arg7[%c0_11, %c0_12], %12 {strides = array<i32>} : memref<8x128xf32, #tpu.memory_space<vmem>>, vector<8x128xf32>,
    } else {
    }
    %c0 = arith.constant 0 : index
    %c0_1 = arith.constant 0 : index
    %3 = vector.load %arg7[%c0, %c0_1] : memref<8x128xf32, #tpu.memory_space<vmem>>, vector<8x128xf32>
    %c0_2 = arith.constant 0 : index
    %c0_3 = arith.constant 0 : index
    %4 = vector.load %arg3[%c0_2, %c0_3] : memref<8x128xbf16, #tpu.memory_space<vmem>>, vector<8x128xbf16>
    %c0_4 = arith.constant 0 : index
    %c0_5 = arith.constant 0 : index
    %5 = vector.load %arg4[%c0_4, %c0_5] : memref<128x128xbf16, #tpu.memory_space<vmem>>, vector<128x128xbf16>
    %cst = arith.constant dense<0.000000e+00> : vector<8x128xf32>
    %6 = tpu.matmul %4, %5, %cst {dimension_numbers = #tpu.dot_dimension_numbers<[1], [0], [0], [1], [0, 0, 1, 1], [], []>} : vector<8x128xbf16>, vector<128x128xbf16>, vector<8x128xf32> -> vector<8x128xf32>
    %7 = arith.addf %3, %6 : vector<8x128xf32>
    %c0_6 = arith.constant 0 : index
    %c0_7 = arith.constant 0 : index
    %8 = vector.load %arg7[%c0_6, %c0_7] : memref<8x128xf32, #tpu.memory_space<vmem>>, vector<8x128xf32>
    tpu.vector_store %arg7[%c0_6, %c0_7], %7 {strides = array<i32>} : memref<8x128xf32, #tpu.memory_space<vmem>>, vector<8x128xf32>,
    %c0_i32_8 = arith.constant 0 : i32
    %9 = arith.cmpi eq, %arg2, %c0_i32_8 : i32
    %10 = arith.extui %9 : i1 to i32
    %c0_i32_9 = arith.constant 0 : i32
    %11 = arith.cmpi ne, %10, %c0_i32_9 : i32
    scf.if %11 {
      %c0_10 = arith.constant 0 : index
      %c0_11 = arith.constant 0 : index
      %12 = vector.load %arg7[%c0_10, %c0_11] : memref<8x128xf32, #tpu.memory_space<vmem>>, vector<8x128xf32>
      %c0_12 = arith.constant 0 : index
      %c0_13 = arith.constant 0 : index
      %13 = vector.load %arg5[%c0_12, %c0_13] : memref<1x128xf32, #tpu.memory_space<vmem>>, vector<1x128xf32>
      %14 = vector.broadcast %13 : vector<1x128xf32> to vector<8x128xf32>
      %15 = arith.addf %12, %14 : vector<8x128xf32>
      %16 = arith.truncf %15 : vector<8x128xf32> to vector<8x128xbf16>
      %c0_14 = arith.constant 0 : index
      %c0_15 = arith.constant 0 : index
      %17 = vector.load %arg6[%c0_14, %c0_15] : memref<8x128xbf16, #tpu.memory_space<vmem>>, vector<8x128xbf16>
      tpu.vector_store %arg6[%c0_14, %c0_15], %16 {strides = array<i32>} : memref<8x128xbf16, #tpu.memory_space<vmem>>, vector<8x128xbf16>,
    } else {
    }
    return
  }
  func.func @transform_0(%arg0: i32, %arg1: i32, %arg2: i32) -> (i32, i32) {
    %c0_i32 = arith.constant 0 : i32
    return %arg0, %arg2 : i32, i32
  }
  func.func @transform_1(%arg0: i32, %arg1: i32, %arg2: i32) -> (i32, i32) {
    %c0_i32 = arith.constant 0 : i32
    return %arg2, %arg1 : i32, i32
  }
  func.func @transform_2(%arg0: i32, %arg1: i32, %arg2: i32) -> (i32, i32) {
    %c0_i32 = arith.constant 0 : i32
    %c0_i32_0 = arith.constant 0 : i32
    return %c0_i32, %arg1 : i32, i32
  }
  func.func @transform_3(%arg0: i32, %arg1: i32, %arg2: i32) -> (i32, i32) {
    %c0_i32 = arith.constant 0 : i32
    return %arg0, %arg1 : i32, i32
  }
}

</mosaic_0001>

<bundles_post_ra>
// kernel: gcn_forward.11
= control target key start
LH: loop header
LB: loop body
LE: loop exit
PB: predicated region body
PF: predicated region fallthrough
CT: control target
= control target key end

     0   :  { %v193_v0 = vmov 0.0   ;;  %vm194_vm0 = vmmov 0   ;;  %s248_s1 = inlined_call_operand.vmem [shape: bf16[128,128], index: 1, kind: input, shape index: {}]   ;;  %s249_s0 = inlined_call_operand.vmem [shape: bf16[8,128], index: 0, kind: input, shape index: {}]   ;;  %s250_s2 = inlined_call_operand.vmem [shape: f32[1,128], index: 2, kind: input, shape index: {}]   ;;  %s251_s3 = inlined_call_operand.vmem [shape: f32[8,128], index: 3, kind: output, shape index: {}]  }
   0x1   :  { %163 = vmatprep.subr.bf16.mxu0 %v193_v0  ;;  %v185_v1 = vld [vmem:[%s248_s1] sm:$0xff]   ;;  %179 = vmatprep.mubr.msk.bf16.mxu0 %vm194_vm0, %v193_v0  ;;  %v186_v2 = vld [vmem:[%s248_s1 + $0x8] sm:$0xff]   ;;  %v187_v3 = vld [vmem:[%s248_s1 + $0x10] sm:$0xff]  }
   0x2   :  { %164 = vmatpush3.bf16.msra.mxu0 %v185_v1  ;;  %v188_v4 = vld [vmem:[%s248_s1 + $0x18] sm:$0xff]   ;;  %v189_v5 = vld [vmem:[%s248_s1 + $0x20] sm:$0xff]   ;;  %v190_v6 = vld [vmem:[%s248_s1 + $0x28] sm:$0xff]  }
   0x3   :  { %165 = vmatprep.subr.bf16.mxu0 %v193_v0  ;;  %v191_v7 = vld [vmem:[%s248_s1 + $0x30] sm:$0xff]   ;;  %v192_v8 = vld [vmem:[%s248_s1 + $0x38] sm:$0xff]   ;;  %v21_v9 = vld [vmem:[%s249_s0] sm:$0xf] }
   0x4   :  { %v153_v10 = vld [vmem:[%s250_s2] ss:$0 sm:$0xff] }
   0x6   :  { %166 = vmatpush3.bf16.msra.mxu0 %v186_v2 }
   0x7   :  { %167 = vmatprep.subr.bf16.mxu0 %v193_v0 }
   0xa   :  { %168 = vmatpush3.bf16.msra.mxu0 %v187_v3 }
   0xb   :  { %169 = vmatprep.subr.bf16.mxu0 %v193_v0 }
   0xe   :  { %170 = vmatpush3.bf16.msra.mxu0 %v188_v4 }
   0xf   :  { %171 = vmatprep.subr.bf16.mxu0 %v193_v0 }
  0x12   :  { %172 = vmatpush3.bf16.msra.mxu0 %v189_v5 }
  0x13   :  { %173 = vmatprep.subr.bf16.mxu0 %v193_v0 }
  0x16   :  { %174 = vmatpush3.bf16.msra.mxu0 %v190_v6 }
  0x17   :  { %175 = vmatprep.subr.bf16.mxu0 %v193_v0 }
  0x1a   :  { %176 = vmatpush3.bf16.msra.mxu0 %v191_v7 }
  0x1b   :  { %177 = vmatprep.subr.bf16.mxu0 %v193_v0 }
  0x1e   :  { %178 = vmatpush3.bf16.msra.mxu0 %v192_v8 }
  0x21   :  { %180 = vmatmul.mubr.bf16.vlgmr.msra.gmra.mrb[0].mxu0 %v21_v9 }
  0xf4   :  { %v120_v11 = vpop.f32.mrb[0].mxu0 }
  0xf5   :  { %v139_v12 = vadd.f32 %v153_v10, %v120_v11  ;;  %v181_v13 = vpop.f32.mrb[1].mxu0 }
  0xf6   :  { %v123_v14 = vpop.f32.mrb[2].mxu0 }
  0xf7   :  { %140 = vst [vmem:[%s251_s3] sm:$0xff] %v139_v12  ;;  %v182_v15 = vpop.f32.mrb[3].mxu0 }

// kernel: gcn_forward.7
= control target key start
LH: loop header
LB: loop body
LE: loop exit
PB: predicated region body
PF: predicated region fallthrough
CT: control target
= control target key end

     0   :  { %s721_s1 = inlined_call_operand.vmem [shape: bf16[128,128], index: 1, kind: input, shape index: {}]   ;;  %s722_s0 = inlined_call_operand.vmem [shape: bf16[128,128], index: 0, kind: input, shape index: {}]   ;;  %s723_s2 = inlined_call_operand.vmem [shape: f32[1,128], index: 2, kind: input, shape index: {}]   ;;  %s724_s3 = inlined_call_operand.vmem [shape: bf16[128,128], index: 3, kind: output, shape index: {}]  }
   0x1   :  { %v610_v0 = vld [vmem:[%s721_s1] sm:$0xff]   ;;  %v611_v1 = vld [vmem:[%s721_s1 + $0x8] sm:$0xff]   ;;  %v612_v2 = vld [vmem:[%s721_s1 + $0x10] sm:$0xff]  }
   0x2   :  { %562 = vmatprep.subr.bf16.mxu0 %v610_v0  ;;  %594 = vmatprep.subr.bf16.mxu1 %v610_v0  ;;  %v613_v3 = vld [vmem:[%s721_s1 + $0x18] sm:$0xff]   ;;  %v618_v4 = vld [vmem:[%s722_s0] sm:$0xff]   ;;  %v615_v7 = vld [vmem:[%s721_s1 + $0x28] sm:$0xff]  }
   0x3   :  { %563 = vmatpush3.bf16.msra.mxu0 %v610_v0  ;;  %602 = vmatpush3.bf16.msra.mxu1 %v610_v0  ;;  %v619_v5 = vld [vmem:[%s722_s0 + $0x20] sm:$0xff]   ;;  %v616_v8 = vld [vmem:[%s721_s1 + $0x30] sm:$0xff]   ;;  %v617_v9 = vld [vmem:[%s721_s1 + $0x38] sm:$0xff]  }
   0x4   :  { %564 = vmatprep.subr.bf16.mxu0 %v611_v1  ;;  %595 = vmatprep.subr.bf16.mxu1 %v611_v1  ;;  %v614_v6 = vld [vmem:[%s721_s1 + $0x20] sm:$0xff]   ;;  %v620_v10 = vld [vmem:[%s722_s0 + $0x8] sm:$0xff]   ;;  %v622_v12 = vld [vmem:[%s722_s0 + $0x10] sm:$0xff]  }
   0x5   :  { %578 = vmatprep.mubr.bf16.mxu0 %v618_v4  ;;  %586 = vmatprep.mubr.bf16.mxu1 %v619_v5  ;;  %v621_v11 = vld [vmem:[%s722_s0 + $0x28] sm:$0xff]   ;;  %v623_v13 = vld [vmem:[%s722_s0 + $0x30] sm:$0xff]   ;;  %v624_v14 = vld [vmem:[%s722_s0 + $0x18] sm:$0xff]  }
   0x6   :  { %v625_v15 = vld [vmem:[%s722_s0 + $0x38] sm:$0xff]   ;;  %v466_v16 = vld [vmem:[%s723_s2] ss:$0 sm:$0xff] }
   0x7   :  { %565 = vmatpush3.bf16.msra.mxu0 %v611_v1  ;;  %603 = vmatpush3.bf16.msra.mxu1 %v611_v1 }
   0x8   :  { %566 = vmatprep.subr.bf16.mxu0 %v612_v2  ;;  %596 = vmatprep.subr.bf16.mxu1 %v612_v2 }
   0xb   :  { %567 = vmatpush3.bf16.msra.mxu0 %v612_v2  ;;  %604 = vmatpush3.bf16.msra.mxu1 %v612_v2 }
   0xc   :  { %568 = vmatprep.subr.bf16.mxu0 %v613_v3  ;;  %597 = vmatprep.subr.bf16.mxu1 %v613_v3 }
   0xf   :  { %569 = vmatpush3.bf16.msra.mxu0 %v613_v3  ;;  %605 = vmatpush3.bf16.msra.mxu1 %v613_v3 }
  0x10   :  { %570 = vmatprep.subr.bf16.mxu0 %v614_v6  ;;  %598 = vmatprep.subr.bf16.mxu1 %v614_v6 }
  0x13   :  { %571 = vmatpush3.bf16.msra.mxu0 %v614_v6  ;;  %606 = vmatpush3.bf16.msra.mxu1 %v614_v6 }
  0x14   :  { %572 = vmatprep.subr.bf16.mxu0 %v615_v7  ;;  %599 = vmatprep.subr.bf16.mxu1 %v615_v7 }
  0x17   :  { %573 = vmatpush3.bf16.msra.mxu0 %v615_v7  ;;  %607 = vmatpush3.bf16.msra.mxu1 %v615_v7 }
  0x18   :  { %574 = vmatprep.subr.bf16.mxu0 %v616_v8  ;;  %600 = vmatprep.subr.bf16.mxu1 %v616_v8 }
  0x1b   :  { %575 = vmatpush3.bf16.msra.mxu0 %v616_v8  ;;  %608 = vmatpush3.bf16.msra.mxu1 %v616_v8 }
  0x1c   :  { %576 = vmatprep.subr.bf16.mxu0 %v617_v9  ;;  %601 = vmatprep.subr.bf16.mxu1 %v617_v9 }
  0x1f   :  { %577 = vmatpush3.bf16.msra.mxu0 %v617_v9  ;;  %609 = vmatpush3.bf16.msra.mxu1 %v617_v9 }
  0x22   :  { %579 = vmatmul.mubr.bf16.vlgmr.msra.gmra.mrb[0].mxu0 %v620_v10  ;;  %587 = vmatmul.mubr.bf16.vlgmr.msra.gmra.mrb[0].mxu1 %v621_v11 }
  0x23   :  { %582 = vmatprep.mubr.bf16.mxu0 %v622_v12  ;;  %590 = vmatprep.mubr.bf16.mxu1 %v623_v13 }
  0x2a   :  { %583 = vmatmul.mubr.bf16.gmra.mrb[4].mxu0 %v624_v14  ;;  %591 = vmatmul.mubr.bf16.gmra.mrb[4].mxu1 %v625_v15 }
  0xf5   :  { %v580_v17 = vpop.f32.mrb[0].mxu0  ;;  %v588_v18 = vpop.f32.mrb[0].mxu1 }
  0xf6   :  { %v336_v19 = vadd.f32 %v580_v17, %v466_v16  ;;  %v344_v20 = vadd.f32 %v588_v18, %v466_v16  ;;  %v213_v21 = vpop.f32.mrb[1].mxu0  ;;  %v245_v22 = vpop.f32.mrb[1].mxu1 }
  0xf7   :  { %v334_v23 = vadd.f32 %v466_v16, %v213_v21  ;;  %v342_v24 = vadd.f32 %v466_v16, %v245_v22  ;;  %v581_v25 = vpop.f32.mrb[2].mxu0  ;;  %v589_v26 = vpop.f32.mrb[2].mxu1 }
  0xf8   :  { %v337_v27 = vadd.f32 %v581_v25, %v466_v16  ;;  %v345_v28 = vadd.f32 %v589_v26, %v466_v16  ;;  %v216_v29 = vpop.f32.mrb[3].mxu0  ;;  %v248_v30 = vpop.f32.mrb[3].mxu1  ;;  %v352_v33 = vmax.f32 %v336_v19, 0.0  ;;  %v360_v34 = vmax.f32 %v344_v20, 0.0 }
  0xf9   :  { %v335_v31 = vadd.f32 %v466_v16, %v216_v29  ;;  %v343_v32 = vadd.f32 %v466_v16, %v248_v30  ;;  %v350_v37 = vmax.f32 %v334_v23, 0.0  ;;  %v358_v38 = vmax.f32 %v342_v24, 0.0 }
  0xfa   :  { %v353_v35 = vmax.f32 %v337_v27, 0.0  ;;  %v361_v36 = vmax.f32 %v345_v28, 0.0 }
  0xfb   :  { %v351_v39 = vmax.f32 %v335_v31, 0.0  ;;  %v359_v40 = vmax.f32 %v343_v32, 0.0 }
  0xfc   :  { %v507_v41 = vpack.c.bf16 %v353_v35, %v352_v33  ;;  %v527_v42 = vpack.c.bf16 %v361_v36, %v360_v34 }
  0xfd   :  { %v502_v43 = vpack.c.bf16 %v351_v39, %v350_v37  ;;  %v522_v44 = vpack.c.bf16 %v359_v40, %v358_v38  ;;  %v584_v45 = vpop.f32.mrb[4].mxu0  ;;  %v592_v46 = vpop.f32.mrb[4].mxu1 }
  0xfe   :  { %539 = vst [vmem:[%s724_s3 + $0x8] sm:$0xff] %v507_v41   ;;  %543 = vst [vmem:[%s724_s3 + $0x28] sm:$0xff] %v527_v42   ;;  %v340_v47 = vadd.f32 %v584_v45, %v466_v16  ;;  %v348_v48 = vadd.f32 %v592_v46, %v466_v16  ;;  %v229_v49 = vpop.f32.mrb[5].mxu0  ;;  %v261_v50 = vpop.f32.mrb[5].mxu1 }
  0xff   :  { %503 = vst [vmem:[%s724_s3] sm:$0xff] %v502_v43   ;;  %542 = vst [vmem:[%s724_s3 + $0x20] sm:$0xff] %v522_v44   ;;  %v338_v51 = vadd.f32 %v466_v16, %v229_v49  ;;  %v346_v52 = vadd.f32 %v466_v16, %v261_v50  ;;  %v585_v53 = vpop.f32.mrb[6].mxu0  ;;  %v593_v54 = vpop.f32.mrb[6].mxu1 }
 0x100   :  { %v341_v55 = vadd.f32 %v585_v53, %v466_v16  ;;  %v349_v56 = vadd.f32 %v593_v54, %v466_v16  ;;  %v232_v57 = vpop.f32.mrb[7].mxu0  ;;  %v264_v58 = vpop.f32.mrb[7].mxu1  ;;  %v356_v61 = vmax.f32 %v340_v47, 0.0  ;;  %v364_v62 = vmax.f32 %v348_v48, 0.0 }
 0x101   :  { %v339_v59 = vadd.f32 %v466_v16, %v232_v57  ;;  %v347_v60 = vadd.f32 %v466_v16, %v264_v58  ;;  %v354_v1 = vmax.f32 %v338_v51, 0.0  ;;  %v362_v2 = vmax.f32 %v346_v52, 0.0 }
 0x102   :  { %v357_v63 = vmax.f32 %v341_v55, 0.0  ;;  %v365_v0 = vmax.f32 %v349_v56, 0.0 }
 0x103   :  { %v355_v3 = vmax.f32 %v339_v59, 0.0  ;;  %v363_v4 = vmax.f32 %v347_v60, 0.0 }
 0x104   :  { %v517_v5 = vpack.c.bf16 %v357_v63, %v356_v61  ;;  %v537_v6 = vpack.c.bf16 %v365_v0, %v364_v62 }
 0x105   :  { %v512_v7 = vpack.c.bf16 %v355_v3, %v354_v1  ;;  %v532_v8 = vpack.c.bf16 %v363_v4, %v362_v2 }
 0x106   :  { %541 = vst [vmem:[%s724_s3 + $0x18] sm:$0xff] %v517_v5   ;;  %545 = vst [vmem:[%s724_s3 + $0x38] sm:$0xff] %v537_v6  }
 0x107   :  { %540 = vst [vmem:[%s724_s3 + $0x10] sm:$0xff] %v512_v7   ;;  %544 = vst [vmem:[%s724_s3 + $0x30] sm:$0xff] %v532_v8  }

// kernel: gcn_forward.10
= control target key start
LH: loop header
LB: loop body
LE: loop exit
PB: predicated region body
PF: predicated region fallthrough
CT: control target
= control target key end

     0   :  { %v194_v0 = vmov 0.0   ;;  %vm195_vm0 = vmmov 0   ;;  %s249_s1 = inlined_call_operand.vmem [shape: bf16[128,128], index: 1, kind: input, shape index: {}]   ;;  %s250_s0 = inlined_call_operand.vmem [shape: bf16[8,128], index: 0, kind: input, shape index: {}]   ;;  %s251_s2 = inlined_call_operand.vmem [shape: f32[1,128], index: 2, kind: input, shape index: {}]   ;;  %s252_s3 = inlined_call_operand.vmem [shape: bf16[8,128], index: 3, kind: output, shape index: {}]  }
   0x1   :  { %164 = vmatprep.subr.bf16.mxu0 %v194_v0  ;;  %v186_v1 = vld [vmem:[%s249_s1] sm:$0xff]   ;;  %180 = vmatprep.mubr.msk.bf16.mxu0 %vm195_vm0, %v194_v0  ;;  %v187_v2 = vld [vmem:[%s249_s1 + $0x8] sm:$0xff]   ;;  %v188_v3 = vld [vmem:[%s249_s1 + $0x10] sm:$0xff]  }
   0x2   :  { %165 = vmatpush3.bf16.msra.mxu0 %v186_v1  ;;  %v189_v4 = vld [vmem:[%s249_s1 + $0x18] sm:$0xff]   ;;  %v190_v5 = vld [vmem:[%s249_s1 + $0x20] sm:$0xff]   ;;  %v191_v6 = vld [vmem:[%s249_s1 + $0x28] sm:$0xff]  }
   0x3   :  { %166 = vmatprep.subr.bf16.mxu0 %v194_v0  ;;  %v192_v7 = vld [vmem:[%s249_s1 + $0x30] sm:$0xff]   ;;  %v193_v8 = vld [vmem:[%s249_s1 + $0x38] sm:$0xff]   ;;  %v21_v9 = vld [vmem:[%s250_s0] sm:$0xf] }
   0x4   :  { %v154_v10 = vld [vmem:[%s251_s2] ss:$0 sm:$0xff] }
   0x6   :  { %167 = vmatpush3.bf16.msra.mxu0 %v187_v2 }
   0x7   :  { %168 = vmatprep.subr.bf16.mxu0 %v194_v0 }
   0xa   :  { %169 = vmatpush3.bf16.msra.mxu0 %v188_v3 }
   0xb   :  { %170 = vmatprep.subr.bf16.mxu0 %v194_v0 }
   0xe   :  { %171 = vmatpush3.bf16.msra.mxu0 %v189_v4 }
   0xf   :  { %172 = vmatprep.subr.bf16.mxu0 %v194_v0 }
  0x12   :  { %173 = vmatpush3.bf16.msra.mxu0 %v190_v5 }
  0x13   :  { %174 = vmatprep.subr.bf16.mxu0 %v194_v0 }
  0x16   :  { %175 = vmatpush3.bf16.msra.mxu0 %v191_v6 }
  0x17   :  { %176 = vmatprep.subr.bf16.mxu0 %v194_v0 }
  0x1a   :  { %177 = vmatpush3.bf16.msra.mxu0 %v192_v7 }
  0x1b   :  { %178 = vmatprep.subr.bf16.mxu0 %v194_v0 }
  0x1e   :  { %179 = vmatpush3.bf16.msra.mxu0 %v193_v8 }
  0x21   :  { %181 = vmatmul.mubr.bf16.vlgmr.msra.gmra.mrb[0].mxu0 %v21_v9 }
  0xf4   :  { %v120_v11 = vpop.f32.mrb[0].mxu0 }
  0xf5   :  { %v139_v12 = vadd.f32 %v154_v10, %v120_v11  ;;  %v182_v13 = vpop.f32.mrb[1].mxu0 }
  0xf6   :  { %v123_v14 = vpop.f32.mrb[2].mxu0 }
  0xf7   :  { %v140_v15 = vpack.c.bf16 %v139_v12, %v139_v12  ;;  %v183_v16 = vpop.f32.mrb[3].mxu0 }
  0xf9   :  { %141 = vst [vmem:[%s252_s3] sm:$0xf] %v140_v15 }

// kernel: gcn_forward.6
= control target key start
LH: loop header
LB: loop body
LE: loop exit
PB: predicated region body
PF: predicated region fallthrough
CT: control target
= control target key end

     0   :  { %s705_s1 = inlined_call_operand.vmem [shape: bf16[128,128], index: 1, kind: input, shape index: {}]   ;;  %s706_s0 = inlined_call_operand.vmem [shape: bf16[128,128], index: 0, kind: input, shape index: {}]   ;;  %s707_s2 = inlined_call_operand.vmem [shape: f32[1,128], index: 2, kind: input, shape index: {}]   ;;  %s708_s3 = inlined_call_operand.vmem [shape: bf16[128,128], index: 3, kind: output, shape index: {}]  }
   0x1   :  { %v594_v0 = vld [vmem:[%s705_s1] sm:$0xff]   ;;  %v595_v1 = vld [vmem:[%s705_s1 + $0x8] sm:$0xff]   ;;  %v596_v2 = vld [vmem:[%s705_s1 + $0x10] sm:$0xff]  }
   0x2   :  { %546 = vmatprep.subr.bf16.mxu0 %v594_v0  ;;  %578 = vmatprep.subr.bf16.mxu1 %v594_v0  ;;  %v597_v3 = vld [vmem:[%s705_s1 + $0x18] sm:$0xff]   ;;  %v602_v4 = vld [vmem:[%s706_s0] sm:$0xff]   ;;  %v599_v7 = vld [vmem:[%s705_s1 + $0x28] sm:$0xff]  }
   0x3   :  { %547 = vmatpush3.bf16.msra.mxu0 %v594_v0  ;;  %586 = vmatpush3.bf16.msra.mxu1 %v594_v0  ;;  %v603_v5 = vld [vmem:[%s706_s0 + $0x20] sm:$0xff]   ;;  %v600_v8 = vld [vmem:[%s705_s1 + $0x30] sm:$0xff]   ;;  %v601_v9 = vld [vmem:[%s705_s1 + $0x38] sm:$0xff]  }
   0x4   :  { %548 = vmatprep.subr.bf16.mxu0 %v595_v1  ;;  %579 = vmatprep.subr.bf16.mxu1 %v595_v1  ;;  %v598_v6 = vld [vmem:[%s705_s1 + $0x20] sm:$0xff]   ;;  %v604_v10 = vld [vmem:[%s706_s0 + $0x8] sm:$0xff]   ;;  %v606_v12 = vld [vmem:[%s706_s0 + $0x10] sm:$0xff]  }
   0x5   :  { %562 = vmatprep.mubr.bf16.mxu0 %v602_v4  ;;  %570 = vmatprep.mubr.bf16.mxu1 %v603_v5  ;;  %v605_v11 = vld [vmem:[%s706_s0 + $0x28] sm:$0xff]   ;;  %v607_v13 = vld [vmem:[%s706_s0 + $0x30] sm:$0xff]   ;;  %v608_v14 = vld [vmem:[%s706_s0 + $0x18] sm:$0xff]  }
   0x6   :  { %v609_v15 = vld [vmem:[%s706_s0 + $0x38] sm:$0xff]   ;;  %v450_v17 = vld [vmem:[%s707_s2] ss:$0 sm:$0xff] }
   0x7   :  { %549 = vmatpush3.bf16.msra.mxu0 %v595_v1  ;;  %587 = vmatpush3.bf16.msra.mxu1 %v595_v1 }
   0x8   :  { %550 = vmatprep.subr.bf16.mxu0 %v596_v2  ;;  %580 = vmatprep.subr.bf16.mxu1 %v596_v2 }
   0xb   :  { %551 = vmatpush3.bf16.msra.mxu0 %v596_v2  ;;  %588 = vmatpush3.bf16.msra.mxu1 %v596_v2 }
   0xc   :  { %552 = vmatprep.subr.bf16.mxu0 %v597_v3  ;;  %581 = vmatprep.subr.bf16.mxu1 %v597_v3 }
   0xf   :  { %553 = vmatpush3.bf16.msra.mxu0 %v597_v3  ;;  %589 = vmatpush3.bf16.msra.mxu1 %v597_v3 }
  0x10   :  { %554 = vmatprep.subr.bf16.mxu0 %v598_v6  ;;  %582 = vmatprep.subr.bf16.mxu1 %v598_v6 }
  0x13   :  { %555 = vmatpush3.bf16.msra.mxu0 %v598_v6  ;;  %590 = vmatpush3.bf16.msra.mxu1 %v598_v6 }
  0x14   :  { %556 = vmatprep.subr.bf16.mxu0 %v599_v7  ;;  %583 = vmatprep.subr.bf16.mxu1 %v599_v7 }
  0x17   :  { %557 = vmatpush3.bf16.msra.mxu0 %v599_v7  ;;  %591 = vmatpush3.bf16.msra.mxu1 %v599_v7 }
  0x18   :  { %558 = vmatprep.subr.bf16.mxu0 %v600_v8  ;;  %584 = vmatprep.subr.bf16.mxu1 %v600_v8 }
  0x1b   :  { %559 = vmatpush3.bf16.msra.mxu0 %v600_v8  ;;  %592 = vmatpush3.bf16.msra.mxu1 %v600_v8 }
  0x1c   :  { %560 = vmatprep.subr.bf16.mxu0 %v601_v9  ;;  %585 = vmatprep.subr.bf16.mxu1 %v601_v9 }
  0x1f   :  { %561 = vmatpush3.bf16.msra.mxu0 %v601_v9  ;;  %593 = vmatpush3.bf16.msra.mxu1 %v601_v9 }
  0x22   :  { %563 = vmatmul.mubr.bf16.vlgmr.msra.gmra.mrb[0].mxu0 %v604_v10  ;;  %571 = vmatmul.mubr.bf16.vlgmr.msra.gmra.mrb[0].mxu1 %v605_v11 }
  0x23   :  { %566 = vmatprep.mubr.bf16.mxu0 %v606_v12  ;;  %574 = vmatprep.mubr.bf16.mxu1 %v607_v13 }
  0x2a   :  { %567 = vmatmul.mubr.bf16.gmra.mrb[4].mxu0 %v608_v14  ;;  %575 = vmatmul.mubr.bf16.gmra.mrb[4].mxu1 %v609_v15 }
  0xf5   :  { %v564_v16 = vpop.f32.mrb[0].mxu0  ;;  %v572_v18 = vpop.f32.mrb[0].mxu1 }
  0xf6   :  { %v213_v19 = vpop.f32.mrb[1].mxu0  ;;  %v245_v20 = vpop.f32.mrb[1].mxu1  ;;  %v336_v23 = vadd.f32 %v564_v16, %v450_v17  ;;  %v344_v24 = vadd.f32 %v572_v18, %v450_v17 }
  0xf7   :  { %v565_v21 = vpop.f32.mrb[2].mxu0  ;;  %v573_v22 = vpop.f32.mrb[2].mxu1  ;;  %v334_v29 = vadd.f32 %v450_v17, %v213_v19  ;;  %v342_v30 = vadd.f32 %v450_v17, %v245_v20 }
  0xf8   :  { %v337_v25 = vadd.f32 %v565_v21, %v450_v17  ;;  %v345_v26 = vadd.f32 %v573_v22, %v450_v17  ;;  %v216_v27 = vpop.f32.mrb[3].mxu0  ;;  %v248_v28 = vpop.f32.mrb[3].mxu1 }
  0xf9   :  { %v335_v31 = vadd.f32 %v450_v17, %v216_v27  ;;  %v343_v32 = vadd.f32 %v450_v17, %v248_v28 }
  0xfa   :  { %v491_v33 = vpack.c.bf16 %v337_v25, %v336_v23  ;;  %v511_v34 = vpack.c.bf16 %v345_v26, %v344_v24 }
  0xfb   :  { %v486_v35 = vpack.c.bf16 %v335_v31, %v334_v29  ;;  %v506_v36 = vpack.c.bf16 %v343_v32, %v342_v30 }
  0xfc   :  { %523 = vst [vmem:[%s708_s3 + $0x8] sm:$0xff] %v491_v33   ;;  %527 = vst [vmem:[%s708_s3 + $0x28] sm:$0xff] %v511_v34  }
  0xfd   :  { %487 = vst [vmem:[%s708_s3] sm:$0xff] %v486_v35   ;;  %526 = vst [vmem:[%s708_s3 + $0x20] sm:$0xff] %v506_v36   ;;  %v568_v37 = vpop.f32.mrb[4].mxu0  ;;  %v576_v38 = vpop.f32.mrb[4].mxu1 }
  0xfe   :  { %v229_v39 = vpop.f32.mrb[5].mxu0  ;;  %v261_v40 = vpop.f32.mrb[5].mxu1  ;;  %v340_v43 = vadd.f32 %v568_v37, %v450_v17  ;;  %v348_v44 = vadd.f32 %v576_v38, %v450_v17 }
  0xff   :  { %v569_v41 = vpop.f32.mrb[6].mxu0  ;;  %v577_v42 = vpop.f32.mrb[6].mxu1  ;;  %v338_v49 = vadd.f32 %v450_v17, %v229_v39  ;;  %v346_v50 = vadd.f32 %v450_v17, %v261_v40 }
 0x100   :  { %v341_v45 = vadd.f32 %v569_v41, %v450_v17  ;;  %v349_v46 = vadd.f32 %v577_v42, %v450_v17  ;;  %v232_v47 = vpop.f32.mrb[7].mxu0  ;;  %v264_v48 = vpop.f32.mrb[7].mxu1 }
 0x101   :  { %v339_v51 = vadd.f32 %v450_v17, %v232_v47  ;;  %v347_v52 = vadd.f32 %v450_v17, %v264_v48 }
 0x102   :  { %v501_v53 = vpack.c.bf16 %v341_v45, %v340_v43  ;;  %v521_v54 = vpack.c.bf16 %v349_v46, %v348_v44 }
 0x103   :  { %v496_v55 = vpack.c.bf16 %v339_v51, %v338_v49  ;;  %v516_v56 = vpack.c.bf16 %v347_v52, %v346_v50 }
 0x104   :  { %525 = vst [vmem:[%s708_s3 + $0x18] sm:$0xff] %v501_v53   ;;  %529 = vst [vmem:[%s708_s3 + $0x38] sm:$0xff] %v521_v54  }
 0x105   :  { %524 = vst [vmem:[%s708_s3 + $0x10] sm:$0xff] %v496_v55   ;;  %528 = vst [vmem:[%s708_s3 + $0x30] sm:$0xff] %v516_v56  }

</bundles_post_ra>
